<compile_context>
chip_gen: v7x
topology: tpu7x:2x2x1
jax: 0.10.0
libtpu: 0.0.40
codegen_flags: <defaults>
</compile_context>

<pallas_src>
import jax
import jax.numpy as jnp
from jax.experimental import pallas as pl
from jax.experimental.pallas import tpu as pltpu


def _round_up(x, m):
    return (x + m - 1) // m * m


def _critic_kernel(o_ref, a_ref,
                   w1o_ref, w1a_ref, b1_ref,
                   w2_ref, b2_ref,
                   w3_ref, b3_ref,
                   q_ref):
    # ---- fused layer 1 (both heads); input concat folded into row-split weights.
    h = jnp.dot(o_ref[...], w1o_ref[...], preferred_element_type=jnp.float32)
    h = h + jnp.dot(a_ref[...], w1a_ref[...], preferred_element_type=jnp.float32)
    h = jnp.maximum(h + b1_ref[...], 0.0)                       # (TM, 2*H1)

    # ---- fused layer 2: block-diagonal [[W2,0],[0,W5]] -> one wide MXU pass.
    g = jnp.dot(h, w2_ref[...], preferred_element_type=jnp.float32)
    g = jnp.maximum(g + b2_ref[...], 0.0)                       # (TM, 2*H2)

    # ---- layer 3 (output width 1 per head): elementwise mul + lane reductions
    #      instead of two near-empty N=1 MXU matmuls.
    h2 = w3_ref.shape[1] // 2
    prod = g * w3_ref[...]                                      # (TM, 2*H2)
    q1 = jnp.sum(prod[:, :h2], axis=-1, keepdims=True) + b3_ref[0]
    q2 = jnp.sum(prod[:, h2:], axis=-1, keepdims=True) + b3_ref[1]
    q_ref[...] = jnp.concatenate([q1, q2], axis=-1)             # merged (TM, 2) out


def pack_critic_params(params, obs_dim):
    """One-time packing of the 6 Linear layers into fused kernel operands."""
    (w1, b1, w2, b2, w3, b3, w4, b4, w5, b5, w6, b6) = params
    h1 = w1.shape[1]
    h2 = w2.shape[1]

    # Layer 1: fuse the two heads along the output axis, split rows obs/act.
    w14 = jnp.concatenate([w1, w4], axis=1)                     # (obs+act, 2*H1)
    w14_o = w14[:obs_dim]                                       # (obs_dim, 2*H1)
    w14_a = w14[obs_dim:]                                       # (act_dim, 2*H1)
    b14 = jnp.concatenate([b1, b4], axis=1)                     # (1, 2*H1)

    # Layer 2: block-diagonal fusion.
    zero = jnp.zeros((h1, h2), dtype=w2.dtype)
    w25 = jnp.concatenate(
        [jnp.concatenate([w2, zero], axis=1),
         jnp.concatenate([zero, w5], axis=1)], axis=0)          # (2*H1, 2*H2)
    b25 = jnp.concatenate([b2, b5], axis=1)                     # (1, 2*H2)

    # Layer 3: single row vector of both heads' output weights + scalar biases.
    w36 = jnp.concatenate([w3[:, 0], w6[:, 0]], axis=0).reshape(1, 2 * h2)
    b36 = jnp.concatenate([b3[0], b6[0]], axis=0)               # (2,) -> SMEM

    return (w14_o.astype(jnp.float32), w14_a.astype(jnp.float32),
            b14.astype(jnp.float32), w25.astype(jnp.float32),
            b25.astype(jnp.float32), w36.astype(jnp.float32),
            b36.astype(jnp.float32))


def critic_forward(o, a, packed, *, block_b=None):
    """Pallas implementation of Critic.forward.

    o: (B, obs_dim), a: (B, act_dim). Returns (q1, q2), each (B, 1) float32.
    """
    o = o.astype(jnp.float32)
    a = a.astype(jnp.float32)
    w1o, w1a, b1, w2, b2, w3, b3 = packed

    B, obs_dim = o.shape
    act_dim = a.shape[1]
    two_h1 = w1o.shape[1]
    two_h2 = w2.shape[1]

    # Batch tiling: multiple of 8 sublanes, up to 256 rows per MXU pass.
    if block_b is None:
        block_b = min(_round_up(B, 8), 256)
    b_pad = _round_up(B, block_b)
    if b_pad != B:
        o = jnp.pad(o, ((0, b_pad - B), (0, 0)))
        a = jnp.pad(a, ((0, b_pad - B), (0, 0)))
    grid = (b_pad // block_b,)

    q = pl.pallas_call(
        _critic_kernel,
        out_shape=jax.ShapeDtypeStruct((b_pad, 2), jnp.float32),
        grid_spec=pltpu.PrefetchScalarGridSpec(
            num_scalar_prefetch=0,
            grid=grid,
            in_specs=[
                pl.BlockSpec((block_b, obs_dim), lambda i: (i, 0)),   # o tile
                pl.BlockSpec((block_b, act_dim), lambda i: (i, 0)),   # a tile
                pl.BlockSpec((obs_dim, two_h1), lambda i: (0, 0)),    # W1|W4 (obs rows)
                pl.BlockSpec((act_dim, two_h1), lambda i: (0, 0)),    # W1|W4 (act rows)
                pl.BlockSpec((1, two_h1), lambda i: (0, 0)),          # b1|b4
                pl.BlockSpec((two_h1, two_h2), lambda i: (0, 0)),     # blkdiag(W2,W5)
                pl.BlockSpec((1, two_h2), lambda i: (0, 0)),          # b2|b5
                pl.BlockSpec((1, two_h2), lambda i: (0, 0)),          # w3|w6 row
                pl.BlockSpec(memory_space=pltpu.MemorySpace.SMEM),    # (b3, b6) scalars
            ],
            out_specs=pl.BlockSpec((block_b, 2), lambda i: (i, 0)),
        ),
        compiler_params=pltpu.CompilerParams(
            dimension_semantics=("parallel",)),
    )(o, a, w1o, w1a, b1, w2, b2, w3, b3)

    return q[:B, 0:1], q[:B, 1:2]


def init_critic_params(key, obs_dim, act_dim, hidden_1=128, hidden_2=128):
    """Deterministic parameter init (shapes match nn.Linear in the module).

    Weights are stored transposed relative to PyTorch: (in_features, out_features).
    """
    obs_act_dim = obs_dim + act_dim
    dims = [
        (obs_act_dim, hidden_1),  # l1
        (hidden_1, hidden_2),     # l2
        (hidden_2, 1),            # l3
        (obs_act_dim, hidden_1),  # l4
        (hidden_1, hidden_2),     # l5
        (hidden_2, 1),            # l6
    ]
    params = []
    keys = jax.random.split(key, len(dims) * 2)
    for i, (fan_in, fan_out) in enumerate(dims):
        bound = 1.0 / jnp.sqrt(fan_in)  # matches nn.Linear default uniform bound
        w = jax.random.uniform(keys[2 * i], (fan_in, fan_out),
                               minval=-bound, maxval=bound, dtype=jnp.float32)
        b = jax.random.uniform(keys[2 * i + 1], (1, fan_out),
                               minval=-bound, maxval=bound, dtype=jnp.float32)
        params.append(w)
        params.append(b)
    return tuple(params)


def critic_forward_ref(o, a, params):
    """Pure-JAX reference for correctness check (mirrors the PyTorch module)."""
    (w1, b1, w2, b2, w3, b3, w4, b4, w5, b5, w6, b6) = params
    oa = jnp.concatenate([o, a], axis=1)
    h = jax.nn.relu(oa @ w1 + b1)
    h = jax.nn.relu(h @ w2 + b2)
    q1 = h @ w3 + b3
    g = jax.nn.relu(oa @ w4 + b4)
    g = jax.nn.relu(g @ w5 + b5)
    q2 = g @ w6 + b6
    return q1, q2


if __name__ == "__main__":
    key = jax.random.PRNGKey(0)
    k_o, k_a, k_p = jax.random.split(key, 3)

    batch = 8
    obs_dim = 24   # dim_info = (obs_dim, act_dim); obs_act_dim = 32
    act_dim = 8
    hidden_1 = 128
    hidden_2 = 128

    o = jax.random.normal(k_o, (batch, obs_dim), dtype=jnp.float32)
    a = jax.random.normal(k_a, (batch, act_dim), dtype=jnp.float32)
    params = init_critic_params(k_p, obs_dim, act_dim, hidden_1, hidden_2)
    packed = pack_critic_params(params, obs_dim)   # one-time weight fusion

    q1, q2 = critic_forward(o, a, packed)
    q1 = jax.block_until_ready(q1)
    q2 = jax.block_until_ready(q2)

    q1_ref, q2_ref = critic_forward_ref(o, a, params)
    assert q1.shape == (batch, 1) and q2.shape == (batch, 1)
    assert jnp.allclose(q1, q1_ref, atol=1e-4, rtol=1e-4)
    assert jnp.allclose(q2, q2_ref, atol=1e-4, rtol=1e-4)

    print("KERNEL_OK")
</pallas_src>

<mosaic_0001>
module attributes {stable_mosaic.version = 11 : i64} {
  func.func @_critic_kernel(%arg0: i32, %arg1: memref<8x24xf32, #tpu.memory_space<vmem>>, %arg2: memref<8x8xf32, #tpu.memory_space<vmem>>, %arg3: memref<24x256xf32, #tpu.memory_space<vmem>>, %arg4: memref<8x256xf32, #tpu.memory_space<vmem>>, %arg5: memref<1x256xf32, #tpu.memory_space<vmem>>, %arg6: memref<256x256xf32, #tpu.memory_space<vmem>>, %arg7: memref<1x256xf32, #tpu.memory_space<vmem>>, %arg8: memref<1x256xf32, #tpu.memory_space<vmem>>, %arg9: memref<2xf32, #tpu.memory_space<smem>>, %arg10: memref<8x2xf32, #tpu.memory_space<vmem>>) attributes {dimension_semantics = [#tpu.dimension_semantics<parallel>], iteration_bounds = array<i64: 1>, scalar_prefetch = 0 : i64, scratch_operands = 0 : i64, tpu.core_type = #tpu.core_type<tc>, window_params = [{transform_indices = @transform_0, window_bounds = array<i64: 8, 24>}, {transform_indices = @transform_1, window_bounds = array<i64: 8, 8>}, {pipeline_mode = #tpu.pipeline_mode<synchronous>, transform_indices = @transform_2, window_bounds = array<i64: 24, 256>}, {pipeline_mode = #tpu.pipeline_mode<synchronous>, transform_indices = @transform_3, window_bounds = array<i64: 8, 256>}, {pipeline_mode = #tpu.pipeline_mode<synchronous>, transform_indices = @transform_4, window_bounds = array<i64: 1, 256>}, {pipeline_mode = #tpu.pipeline_mode<synchronous>, transform_indices = @transform_5, window_bounds = array<i64: 256, 256>}, {pipeline_mode = #tpu.pipeline_mode<synchronous>, transform_indices = @transform_6, window_bounds = array<i64: 1, 256>}, {pipeline_mode = #tpu.pipeline_mode<synchronous>, transform_indices = @transform_7, window_bounds = array<i64: 1, 256>}, {transform_indices = @transform_8, window_bounds = array<i64: 2>}, {transform_indices = @transform_9, window_bounds = array<i64: 8, 2>}]} {
    %c0 = arith.constant 0 : index
    %c0_0 = arith.constant 0 : index
    %0 = vector.load %arg1[%c0, %c0_0] : memref<8x24xf32, #tpu.memory_space<vmem>>, vector<8x24xf32>
    %c0_1 = arith.constant 0 : index
    %c0_2 = arith.constant 0 : index
    %1 = vector.load %arg3[%c0_1, %c0_2] : memref<24x256xf32, #tpu.memory_space<vmem>>, vector<24x256xf32>
    %cst = arith.constant dense<0.000000e+00> : vector<8x256xf32>
    %2 = tpu.matmul %0, %1, %cst {dimension_numbers = #tpu.dot_dimension_numbers<[1], [0], [0], [1], [0, 0, 1, 1], [], []>} : vector<8x24xf32>, vector<24x256xf32>, vector<8x256xf32> -> vector<8x256xf32>
    %c0_3 = arith.constant 0 : index
    %c0_4 = arith.constant 0 : index
    %3 = vector.load %arg2[%c0_3, %c0_4] : memref<8x8xf32, #tpu.memory_space<vmem>>, vector<8x8xf32>
    %c0_5 = arith.constant 0 : index
    %c0_6 = arith.constant 0 : index
    %4 = vector.load %arg4[%c0_5, %c0_6] : memref<8x256xf32, #tpu.memory_space<vmem>>, vector<8x256xf32>
    %cst_7 = arith.constant dense<0.000000e+00> : vector<8x256xf32>
    %5 = tpu.matmul %3, %4, %cst_7 {dimension_numbers = #tpu.dot_dimension_numbers<[1], [0], [0], [1], [0, 0, 1, 1], [], []>} : vector<8x8xf32>, vector<8x256xf32>, vector<8x256xf32> -> vector<8x256xf32>
    %6 = arith.addf %2, %5 : vector<8x256xf32>
    %c0_8 = arith.constant 0 : index
    %c0_9 = arith.constant 0 : index
    %7 = vector.load %arg5[%c0_8, %c0_9] : memref<1x256xf32, #tpu.memory_space<vmem>>, vector<1x256xf32>
    %8 = vector.broadcast %7 : vector<1x256xf32> to vector<8x256xf32>
    %9 = arith.addf %6, %8 : vector<8x256xf32>
    %cst_10 = arith.constant 0.000000e+00 : f32
    %10 = vector.broadcast %cst_10 : f32 to vector<8x256xf32>
    %11 = arith.maximumf %9, %10 : vector<8x256xf32>
    %c0_11 = arith.constant 0 : index
    %c0_12 = arith.constant 0 : index
    %12 = vector.load %arg6[%c0_11, %c0_12] : memref<256x256xf32, #tpu.memory_space<vmem>>, vector<256x256xf32>
    %cst_13 = arith.constant dense<0.000000e+00> : vector<8x256xf32>
    %13 = tpu.matmul %11, %12, %cst_13 {dimension_numbers = #tpu.dot_dimension_numbers<[1], [0], [0], [1], [0, 0, 1, 1], [], []>} : vector<8x256xf32>, vector<256x256xf32>, vector<8x256xf32> -> vector<8x256xf32>
    %c0_14 = arith.constant 0 : index
    %c0_15 = arith.constant 0 : index
    %14 = vector.load %arg7[%c0_14, %c0_15] : memref<1x256xf32, #tpu.memory_space<vmem>>, vector<1x256xf32>
    %15 = vector.broadcast %14 : vector<1x256xf32> to vector<8x256xf32>
    %16 = arith.addf %13, %15 : vector<8x256xf32>
    %cst_16 = arith.constant 0.000000e+00 : f32
    %17 = vector.broadcast %cst_16 : f32 to vector<8x256xf32>
    %18 = arith.maximumf %16, %17 : vector<8x256xf32>
    %c0_17 = arith.constant 0 : index
    %c0_18 = arith.constant 0 : index
    %19 = vector.load %arg8[%c0_17, %c0_18] : memref<1x256xf32, #tpu.memory_space<vmem>>, vector<1x256xf32>
    %20 = vector.broadcast %19 : vector<1x256xf32> to vector<8x256xf32>
    %21 = arith.mulf %18, %20 : vector<8x256xf32>
    %22 = vector.extract_strided_slice %21 {offsets = [0, 0], sizes = [8, 128], strides = [1, 1]} : vector<8x256xf32> to vector<8x128xf32>
    %cst_19 = arith.constant dense<0.000000e+00> : vector<8xf32>
    %23 = vector.multi_reduction <add>, %22, %cst_19 [1] : vector<8x128xf32> to vector<8xf32>
    %24 = vector.shape_cast %23 : vector<8xf32> to vector<8x1xf32>
    %c0_20 = arith.constant 0 : index
    %25 = memref.load %arg9[%c0_20] : memref<2xf32, #tpu.memory_space<smem>>
    %26 = vector.broadcast %25 : f32 to vector<8x1xf32>
    %27 = arith.addf %24, %26 : vector<8x1xf32>
    %28 = vector.extract_strided_slice %21 {offsets = [0, 128], sizes = [8, 128], strides = [1, 1]} : vector<8x256xf32> to vector<8x128xf32>
    %cst_21 = arith.constant dense<0.000000e+00> : vector<8xf32>
    %29 = vector.multi_reduction <add>, %28, %cst_21 [1] : vector<8x128xf32> to vector<8xf32>
    %30 = vector.shape_cast %29 : vector<8xf32> to vector<8x1xf32>
    %c1 = arith.constant 1 : index
    %31 = memref.load %arg9[%c1] : memref<2xf32, #tpu.memory_space<smem>>
    %32 = vector.broadcast %31 : f32 to vector<8x1xf32>
    %33 = arith.addf %30, %32 : vector<8x1xf32>
    %34 = tpu.concatenate %27, %33 in 1 : vector<8x1xf32>, vector<8x1xf32> -> vector<8x2xf32>
    %c0_22 = arith.constant 0 : index
    %c0_23 = arith.constant 0 : index
    %35 = vector.load %arg10[%c0_22, %c0_23] : memref<8x2xf32, #tpu.memory_space<vmem>>, vector<8x2xf32>
    tpu.vector_store %arg10[%c0_22, %c0_23], %34 {strides = array<i32>} : memref<8x2xf32, #tpu.memory_space<vmem>>, vector<8x2xf32>,
    return
  }
  func.func @transform_0(%arg0: i32) -> (i32, i32) {
    %c0_i32 = arith.constant 0 : i32
    %c0_i32_0 = arith.constant 0 : i32
    return %arg0, %c0_i32 : i32, i32
  }
  func.func @transform_1(%arg0: i32) -> (i32, i32) {
    %c0_i32 = arith.constant 0 : i32
    %c0_i32_0 = arith.constant 0 : i32
    return %arg0, %c0_i32 : i32, i32
  }
  func.func @transform_2(%arg0: i32) -> (i32, i32) {
    %c0_i32 = arith.constant 0 : i32
    %c0_i32_0 = arith.constant 0 : i32
    %c0_i32_1 = arith.constant 0 : i32
    return %c0_i32, %c0_i32_0 : i32, i32
  }
  func.func @transform_3(%arg0: i32) -> (i32, i32) {
    %c0_i32 = arith.constant 0 : i32
    %c0_i32_0 = arith.constant 0 : i32
    %c0_i32_1 = arith.constant 0 : i32
    return %c0_i32, %c0_i32_0 : i32, i32
  }
  func.func @transform_4(%arg0: i32) -> (i32, i32) {
    %c0_i32 = arith.constant 0 : i32
    %c0_i32_0 = arith.constant 0 : i32
    %c0_i32_1 = arith.constant 0 : i32
    return %c0_i32, %c0_i32_0 : i32, i32
  }
  func.func @transform_5(%arg0: i32) -> (i32, i32) {
    %c0_i32 = arith.constant 0 : i32
    %c0_i32_0 = arith.constant 0 : i32
    %c0_i32_1 = arith.constant 0 : i32
    return %c0_i32, %c0_i32_0 : i32, i32
  }
  func.func @transform_6(%arg0: i32) -> (i32, i32) {
    %c0_i32 = arith.constant 0 : i32
    %c0_i32_0 = arith.constant 0 : i32
    %c0_i32_1 = arith.constant 0 : i32
    return %c0_i32, %c0_i32_0 : i32, i32
  }
  func.func @transform_7(%arg0: i32) -> (i32, i32) {
    %c0_i32 = arith.constant 0 : i32
    %c0_i32_0 = arith.constant 0 : i32
    %c0_i32_1 = arith.constant 0 : i32
    return %c0_i32, %c0_i32_0 : i32, i32
  }
  func.func @transform_8(%arg0: i32) -> i32 {
    %c0_i32 = arith.constant 0 : i32
    %c0_i32_0 = arith.constant 0 : i32
    return %c0_i32 : i32
  }
  func.func @transform_9(%arg0: i32) -> (i32, i32) {
    %c0_i32 = arith.constant 0 : i32
    %c0_i32_0 = arith.constant 0 : i32
    return %arg0, %c0_i32 : i32, i32
  }
}

</mosaic_0001>

<bundles_post_ra>
// kernel: tpu_custom_call.1
= control target key start
LH: loop header
LB: loop body
LE: loop exit
PB: predicated region body
PF: predicated region fallthrough
CT: control target
= control target key end

     0   :  { %14 = vsyncpa [#allocation3], 0  ;;  %s821_s0 = inlined_call_operand.hbm [shape: f32[8,24], index: 0, kind: input, shape index: {}]   ;;  %s822_s1 = inlined_call_operand.hbm [shape: f32[8,8], index: 1, kind: input, shape index: {}]   ;;  %s823_s2 = inlined_call_operand.hbm [shape: f32[24,256], index: 2, kind: input, shape index: {}]   ;;  %s824_s3 = inlined_call_operand.hbm [shape: f32[8,256], index: 3, kind: input, shape index: {}]   ;;  %s825_s4 = inlined_call_operand.vmem [shape: f32[1,256], index: 4, kind: input, shape index: {}]   ;;  %s826_s5 = inlined_call_operand.hbm [shape: f32[256,256], index: 5, kind: input, shape index: {}]   ;;  %s827_s6 = inlined_call_operand.vmem [shape: f32[1,256], index: 6, kind: input, shape index: {}]   ;;  %s828_s7 = inlined_call_operand.vmem [shape: f32[1,256], index: 7, kind: input, shape index: {}]   ;;  %s829_s8 = inlined_call_operand.vmem [shape: f32[2], index: 8, kind: input, shape index: {}]   ;;  %s830_s9 = inlined_call_operand.vmem [shape: f32[8,2], index: 9, kind: output, shape index: {}]  }
   0x1   :  { %15 = vsyncpa [#allocation6], 0 }
   0x2   :  { %16 = vsyncpa [#allocation9], 0 }
   0x3   :  { %17 = vsyncpa [#allocation4], 0  ;;  %s680_s30 = smov [#allocation5]   ;;  %s681_s11 = smov [#allocation8]  }
   0x4   :  { %s34_s10 = sshll.u32 %s680_s30, 4  ;;  %s56_s12 = sshll.u32 %s681_s11, 4  ;;  %s35_s10 = int_to_ptr.vmem [resolvable:$true] %s34_s10  ;;  %s57_s12 = int_to_ptr.vmem [resolvable:$true] %s56_s12 }
   0x5   :  { %s550_s15 = scalar_lea.hbm %s822_s1, 128 }
   0x6   :  { %p551_p0 = scmp.ne.s32.totalorder %s822_s1, %s550_s15  ;;  %p554_p1 = scmp.lt.u32.totalorder %s550_s15, %s822_s1 }
   0x8   :  { %p556_p2 = pnand %p554_p1, %p551_p0 }
   0xa   :  { %559 = shalt.err (!%p556_p2)
}
   0xb   :  { %s560_s20 = scalar_lea.vmem %s35_s10, 128  ;;  %p565_p4 = scmp.lt.s32.totalorder %s35_s10, %s35_s10 }
   0xc   :  { %p561_p3 = scmp.ne.s32.totalorder %s35_s10, %s560_s20  ;;  %p566_p5 = scmp.lt.s32.totalorder %s560_s20, %s560_s20 }
   0xe   :  { %p567_p6 = por %p566_p5, %p565_p4 }
  0x10   :  { %p568_p7 = pnand %p567_p6, %p561_p3 }
  0x12   :  { %571 = shalt.err (!%p568_p7)
}
  0x13   :  { %37 = dma.hbm_to_vmem [thread:$0]  %s822_s1, 128, %s35_s10, [#allocation6]  }
  0x14   :  { %s572_s25 = scalar_lea.hbm %s824_s3, 256 }
  0x15   :  { %p573_p8 = scmp.ne.s32.totalorder %s824_s3, %s572_s25  ;;  %p576_p9 = scmp.lt.u32.totalorder %s572_s25, %s824_s3 }
  0x17   :  { %p578_p10 = pnand %p576_p9, %p573_p8 }
  0x19   :  { %581 = shalt.err (!%p578_p10)
}
  0x1a   :  { %s582_s30 = scalar_lea.vmem %s57_s12, 256  ;;  %p587_p12 = scmp.lt.s32.totalorder %s57_s12, %s57_s12 }
  0x1b   :  { %p583_p11 = scmp.ne.s32.totalorder %s57_s12, %s582_s30  ;;  %p588_p13 = scmp.lt.s32.totalorder %s582_s30, %s582_s30 }
  0x1d   :  { %p589_p0 = por %p588_p13, %p587_p12 }
  0x1f   :  { %p590_p1 = pnand %p589_p0, %p583_p11 }
  0x21   :  { %593 = shalt.err (!%p590_p1)
}
  0x22   :  { %59 = dma.hbm_to_vmem [thread:$0]  %s824_s3, 256, %s57_s12, [#allocation9]  }
  0x23   :  { %s682_s11 = smov [#allocation2]   ;;  %s683_s14 = smov [#allocation7]  }
  0x24   :  { %s24_s13 = sshll.u32 %s682_s11, 4  ;;  %s43_s15 = sshll.u32 %s683_s14, 4  ;;  %s25_s13 = int_to_ptr.vmem [resolvable:$true] %s24_s13  ;;  %s763_s15 = int_to_ptr.vmem [resolvable:$true] %s43_s15 }
  0x25   :  { %s594_s18 = scalar_lea.hbm %s821_s0, 128 }
  0x26   :  { %p595_p2 = scmp.ne.s32.totalorder %s821_s0, %s594_s18  ;;  %p598_p3 = scmp.lt.u32.totalorder %s594_s18, %s821_s0 }
  0x28   :  { %p600_p4 = pnand %p598_p3, %p595_p2 }
  0x2a   :  { %603 = shalt.err (!%p600_p4)
}
  0x2b   :  { %s604_s3 = scalar_lea.vmem %s25_s13, 128  ;;  %p609_p6 = scmp.lt.s32.totalorder %s25_s13, %s25_s13 }
  0x2c   :  { %p605_p5 = scmp.ne.s32.totalorder %s25_s13, %s604_s3  ;;  %p610_p7 = scmp.lt.s32.totalorder %s604_s3, %s604_s3 }
  0x2e   :  { %p611_p8 = por %p610_p7, %p609_p6 }
  0x30   :  { %p612_p9 = pnand %p611_p8, %p605_p5 }
  0x32   :  { %615 = shalt.err (!%p612_p9)
}
  0x33   :  { %27 = dma.hbm_to_vmem [thread:$0]  %s821_s0, 128, %s25_s13, [#allocation3]  }
  0x34   :  { %s616_s26 = scalar_lea.hbm %s823_s2, 768 }
  0x35   :  { %p617_p10 = scmp.ne.s32.totalorder %s823_s2, %s616_s26  ;;  %p620_p11 = scmp.lt.u32.totalorder %s616_s26, %s823_s2 }
  0x37   :  { %p622_p12 = pnand %p620_p11, %p617_p10 }
  0x39   :  { %625 = shalt.err (!%p622_p12)
}
  0x3a   :  { %s626_s1 = scalar_lea.vmem %s763_s15, 768  ;;  %p631_p0 = scmp.lt.s32.totalorder %s763_s15, %s763_s15 }
  0x3b   :  { %p627_p13 = scmp.ne.s32.totalorder %s763_s15, %s626_s1  ;;  %p632_p1 = scmp.lt.s32.totalorder %s626_s1, %s626_s1 }
  0x3d   :  { %p633_p2 = por %p632_p1, %p631_p0 }
  0x3f   :  { %p634_p3 = pnand %p633_p2, %p627_p13 }
  0x41   :  { %637 = shalt.err (!%p634_p3)
}
  0x42   :  { %s684_s0 = smov 256   ;;  %s685_s10 = smov 16  }
  0x43   :  { %49 = dma.hbm_to_vmem [thread:$0]  %s823_s2, 768, %s763_s15, [#allocation6], %s684_s0, %s684_s0, %s685_s10  }
  0x44   :  { %s84_s17 = sshll.u32 %s829_s8, 4  ;;  %s686_s18 = smov [#allocation10]   ;;  %s85_s17 = int_to_ptr.vmem [resolvable:$true] %s84_s17 }
  0x45   :  { %s67_s19 = sshll.u32 %s686_s18, 4  ;;  %s638_s22 = scalar_lea.hbm %s826_s5, 8192  ;;  %s68_s19 = int_to_ptr.vmem [resolvable:$true] %s67_s19 }
  0x46   :  { %p639_p4 = scmp.ne.s32.totalorder %s826_s5, %s638_s22  ;;  %p642_p5 = scmp.lt.u32.totalorder %s638_s22, %s826_s5 }
  0x48   :  { %p644_p6 = pnand %p642_p5, %p639_p4 }
  0x4a   :  { %647 = shalt.err (!%p644_p6)
}
  0x4b   :  { %s648_s2 = scalar_lea.vmem %s68_s19, 8192  ;;  %p653_p8 = scmp.lt.s32.totalorder %s68_s19, %s68_s19 }
  0x4c   :  { %p649_p7 = scmp.ne.s32.totalorder %s68_s19, %s648_s2  ;;  %p654_p9 = scmp.lt.s32.totalorder %s648_s2, %s648_s2 }
  0x4e   :  { %p655_p10 = por %p654_p9, %p653_p8 }
  0x50   :  { %p656_p11 = pnand %p655_p10, %p649_p7 }
  0x52   :  { %659 = shalt.err (!%p656_p11)
}
  0x53   :  { %73 = dma.hbm_to_vmem [thread:$0]  %s826_s5, 8192, %s68_s19, [#allocation9], %s684_s0, %s684_s0, %s685_s10  }
  0x54   :  { %s660_s25 = scalar_lea.vmem %s85_s17, 16  ;;  %p665_p13 = scmp.lt.s32.totalorder %s85_s17, %s85_s17 }
  0x55   :  { %p661_p12 = scmp.ne.s32.totalorder %s85_s17, %s660_s25  ;;  %p666_p0 = scmp.lt.s32.totalorder %s660_s25, %s660_s25 }
  0x57   :  { %p667_p1 = por %p666_p0, %p665_p13 }
  0x59   :  { %p668_p2 = pnand %p667_p1, %p661_p12 }
  0x5b   :  { %671 = shalt.err (!%p668_p2)
}
  0x5c   :  { %s687_s26 = smov [#allocation11]  }
  0x5d   :  { %87 = dma.vmem_to_smem %s85_s17, 16, %s687_s26, [#allocation4]  }
  0x5e   :  { %672 = dma.done.wait [#allocation3], 128  }
  0x5f   :  { %673 = vsyncadd [#allocation3], 4294967168 }
  0x60   :  { %674 = dma.done.wait [#allocation6], 896  }
  0x61   :  { %675 = vsyncadd [#allocation6], 4294966400 }
  0x62   :  { %676 = dma.done.wait [#allocation9], 8448  }
  0x63   :  { %677 = vsyncadd [#allocation9], 4294958848 }
  0x64   :  { %678 = dma.done.wait [#allocation4], 16  }
  0x65   :  { %679 = vsyncadd [#allocation4], 4294967280 }
  0x66   :  { %106 = sfence }
  0x67   :  { %v116_v0 = vld [vmem:[#allocation8 + $0x8] sm:$0xff]  ;;  %v115_v1 = vld [vmem:[#allocation8] sm:$0xff]  ;;  %vm117_vm0 = vcmask 64512   ;;  %v688_v3 = vmov 0.0   ;;  %v109_v4 = vld [vmem:[#allocation7 + $0x8] sm:$0xff]  ;;  %vm192_vm1 = vcmask 195584  }
  0x68   :  { %v114_v2 = vld [vmem:[#allocation5] sm:$0xff]  ;;  %121 = vmatprep.subr.mxu0 %v116_v0  ;;  %185 = vmatprep.mubr.f32.mxu0 %v688_v3  ;;  %v108_v6 = vld [vmem:[#allocation7] sm:$0xff]  ;;  %v110_v8 = vld [vmem:[#allocation7 + $0x10] sm:$0xff]  ;;  %vm456_vm2 = vcmask 7168   ;;  %vm458_vm3 = vcmask 15360  }
  0x69   :  { %v111_v5 = vld [vmem:[#allocation7 + $0x18] sm:$0xff]  ;;  %122 = vmatpush1.msra.mxu0 %v115_v1  ;;  %v473_v9 = vpack.c.bf16 %v110_v8, %v108_v6  ;;  %v113_v10 = vld [vmem:[#allocation7 + $0x28] sm:$0xff]  ;;  %v283_v14 = vld [vmem:[#allocation10] sm:$0xff] }
  0x6a   :  { %v471_v7 = vpack.c.bf16 %v111_v5, %v109_v4  ;;  %468 = vmatmul.mubr.msk.f32.vlgmr.msra.gmra.mrb[0].mxu0 %vm117_vm0, %v114_v2  ;;  %v284_v11 = vld [vmem:[#allocation10 + $0x8] sm:$0xff]  ;;  %v286_v12 = vld [vmem:[#allocation10 + $0x18] sm:$0xff]  ;;  %v285_v15 = vld [vmem:[#allocation10 + $0x10] sm:$0xff] }
  0x6b   :  { %260 = vmatprep.mubr.f32.mxu0 %v688_v3  ;;  %v475_v13 = vpack.c.bf16 %v286_v12, %v284_v11  ;;  %v288_v16 = vld [vmem:[#allocation10 + $0x28] sm:$0xff]  ;;  %v477_v17 = vpack.c.bf16 %v285_v15, %v283_v14  ;;  %v290_v18 = vld [vmem:[#allocation10 + $0x38] sm:$0xff]  ;;  %v287_v19 = vld [vmem:[#allocation10 + $0x20] sm:$0xff] }
  0x6c   :  { %472 = vmatprep.subr.bf16.mxu0 %v471_v7  ;;  %v289_v20 = vld [vmem:[#allocation10 + $0x30] sm:$0xff]  ;;  %v112_v21 = vld [vmem:[#allocation7 + $0x20] sm:$0xff]  ;;  %v479_v22 = vpack.c.bf16 %v290_v18, %v288_v16  ;;  %v292_v23 = vld [vmem:[#allocation10 + $0x48] sm:$0xff] }
  0x6d   :  { %474 = vmatpush1.bf16.msra.mxu0 %v473_v9  ;;  %476 = vmatprep.subr.bf16.mxu1 %v475_v13  ;;  %v294_v24 = vld [vmem:[#allocation10 + $0x58] sm:$0xff]  ;;  %v481_v25 = vpack.c.bf16 %v289_v20, %v287_v19  ;;  %v107_v26 = vld [vmem:[#allocation2] sm:$0xff]  ;;  %v291_v28 = vld [vmem:[#allocation10 + $0x40] sm:$0xff] }
  0x6e   :  { %200 = vmatprep.subr.mxu0 %v113_v10  ;;  %478 = vmatpush1.bf16.msra.mxu1 %v477_v17  ;;  %v483_v27 = vpack.c.bf16 %v294_v24, %v292_v23  ;;  %v293_v29 = vld [vmem:[#allocation10 + $0x50] sm:$0xff]  ;;  %v296_v30 = vld [vmem:[#allocation10 + $0x68] sm:$0xff]  ;;  %v298_v31 = vld [vmem:[#allocation10 + $0x78] sm:$0xff] }
  0x6f   :  { %480 = vmatprep.subr.bf16.mxu1 %v479_v22  ;;  %v485_v32 = vpack.c.bf16 %v293_v29, %v291_v28  ;;  %v487_v33 = vpack.c.bf16 %v298_v31, %v296_v30  ;;  %v295_v34 = vld [vmem:[#allocation10 + $0x60] sm:$0xff]  ;;  %v297_v35 = vld [vmem:[#allocation10 + $0x70] sm:$0xff]  ;;  %v300_v36 = vld [vmem:[#allocation10 + $0x88] sm:$0xff] }
  0x70   :  { %v302_v37 = vld [vmem:[#allocation10 + $0x98] sm:$0xff]  ;;  %v489_v38 = vpack.c.bf16 %v297_v35, %v295_v34  ;;  %v299_v40 = vld [vmem:[#allocation10 + $0x80] sm:$0xff]  ;;  %v301_v41 = vld [vmem:[#allocation10 + $0x90] sm:$0xff] }
  0x71   :  { %201 = vmatpush1.msra.mxu0 %v112_v21  ;;  %v491_v39 = vpack.c.bf16 %v302_v37, %v300_v36  ;;  %v304_v42 = vld [vmem:[#allocation10 + $0xa8] sm:$0xff]  ;;  %v306_v43 = vld [vmem:[#allocation10 + $0xb8] sm:$0xff]  ;;  %v493_v44 = vpack.c.bf16 %v301_v41, %v299_v40  ;;  %v303_v46 = vld [vmem:[#allocation10 + $0xa0] sm:$0xff] }
  0x72   :  { %469 = vmatmul.mubr.msk.f32.vlgmr.msra.gmra.mrb[0].mxu0 %vm192_vm1, %v107_v26  ;;  %482 = vmatpush1.bf16.msra.mxu1 %v481_v25  ;;  %v495_v45 = vpack.c.bf16 %v306_v43, %v304_v42  ;;  %v305_v47 = vld [vmem:[#allocation10 + $0xb0] sm:$0xff]  ;;  %v308_v48 = vld [vmem:[#allocation10 + $0xc8] sm:$0xff]  ;;  %v310_v49 = vld [vmem:[#allocation10 + $0xd8] sm:$0xff] }
  0x73   :  { %484 = vmatprep.subr.bf16.mxu1 %v483_v27  ;;  %v497_v50 = vpack.c.bf16 %v305_v47, %v303_v46  ;;  %v499_v51 = vpack.c.bf16 %v310_v49, %v308_v48  ;;  %v307_v52 = vld [vmem:[#allocation10 + $0xc0] sm:$0xff]  ;;  %v309_v53 = vld [vmem:[#allocation10 + $0xd0] sm:$0xff]  ;;  %v312_v54 = vld [vmem:[#allocation10 + $0xe8] sm:$0xff] }
  0x74   :  { %v314_v55 = vld [vmem:[#allocation10 + $0xf8] sm:$0xff]  ;;  %v501_v56 = vpack.c.bf16 %v309_v53, %v307_v52  ;;  %v311_v58 = vld [vmem:[#allocation10 + $0xe0] sm:$0xff]  ;;  %v313_v59 = vld [vmem:[#allocation10 + $0xf0] sm:$0xff] }
  0x75   :  { %v503_v57 = vpack.c.bf16 %v314_v55, %v312_v54  ;;  %v316_v60 = vld [vmem:[#allocation10 + $0x108] sm:$0xff]  ;;  %v318_v61 = vld [vmem:[#allocation10 + $0x118] sm:$0xff]  ;;  %v505_v62 = vpack.c.bf16 %v313_v59, %v311_v58  ;;  %v315_v0 = vld [vmem:[#allocation10 + $0x100] sm:$0xff] }
  0x76   :  { %486 = vmatpush1.bf16.msra.mxu1 %v485_v32  ;;  %v507_v63 = vpack.c.bf16 %v318_v61, %v316_v60  ;;  %v317_v1 = vld [vmem:[#allocation10 + $0x110] sm:$0xff]  ;;  %v320_v2 = vld [vmem:[#allocation10 + $0x128] sm:$0xff]  ;;  %v322_v3 = vld [vmem:[#allocation10 + $0x138] sm:$0xff] }
  0x77   :  { %488 = vmatprep.subr.bf16.mxu1 %v487_v33  ;;  %v509_v4 = vpack.c.bf16 %v317_v1, %v315_v0  ;;  %v511_v5 = vpack.c.bf16 %v322_v3, %v320_v2  ;;  %v319_v6 = vld [vmem:[#allocation10 + $0x120] sm:$0xff]  ;;  %v321_v7 = vld [vmem:[#allocation10 + $0x130] sm:$0xff]  ;;  %v324_v8 = vld [vmem:[#allocation10 + $0x148] sm:$0xff] }
  0x78   :  { %v326_v9 = vld [vmem:[#allocation10 + $0x158] sm:$0xff]  ;;  %v513_v10 = vpack.c.bf16 %v321_v7, %v319_v6  ;;  %v323_v12 = vld [vmem:[#allocation10 + $0x140] sm:$0xff]  ;;  %v325_v13 = vld [vmem:[#allocation10 + $0x150] sm:$0xff] }
  0x79   :  { %v515_v11 = vpack.c.bf16 %v326_v9, %v324_v8  ;;  %v328_v14 = vld [vmem:[#allocation10 + $0x168] sm:$0xff]  ;;  %v330_v15 = vld [vmem:[#allocation10 + $0x178] sm:$0xff]  ;;  %v517_v16 = vpack.c.bf16 %v325_v13, %v323_v12  ;;  %v327_v18 = vld [vmem:[#allocation10 + $0x160] sm:$0xff] }
  0x7a   :  { %490 = vmatpush1.bf16.msra.mxu1 %v489_v38  ;;  %v519_v17 = vpack.c.bf16 %v330_v15, %v328_v14  ;;  %v329_v19 = vld [vmem:[#allocation10 + $0x170] sm:$0xff]  ;;  %v332_v20 = vld [vmem:[#allocation10 + $0x188] sm:$0xff]  ;;  %v334_v21 = vld [vmem:[#allocation10 + $0x198] sm:$0xff] }
  0x7b   :  { %492 = vmatprep.subr.bf16.mxu1 %v491_v39  ;;  %v521_v22 = vpack.c.bf16 %v329_v19, %v327_v18  ;;  %v523_v23 = vpack.c.bf16 %v334_v21, %v332_v20  ;;  %v331_v24 = vld [vmem:[#allocation10 + $0x180] sm:$0xff]  ;;  %v333_v25 = vld [vmem:[#allocation10 + $0x190] sm:$0xff]  ;;  %v336_v26 = vld [vmem:[#allocation10 + $0x1a8] sm:$0xff] }
  0x7c   :  { %v338_v27 = vld [vmem:[#allocation10 + $0x1b8] sm:$0xff]  ;;  %v525_v28 = vpack.c.bf16 %v333_v25, %v331_v24  ;;  %v335_v30 = vld [vmem:[#allocation10 + $0x1a0] sm:$0xff]  ;;  %v337_v31 = vld [vmem:[#allocation10 + $0x1b0] sm:$0xff] }
  0x7d   :  { %v527_v29 = vpack.c.bf16 %v338_v27, %v336_v26  ;;  %v340_v32 = vld [vmem:[#allocation10 + $0x1c8] sm:$0xff]  ;;  %v342_v33 = vld [vmem:[#allocation10 + $0x1d8] sm:$0xff]  ;;  %v529_v34 = vpack.c.bf16 %v337_v31, %v335_v30  ;;  %v339_v36 = vld [vmem:[#allocation10 + $0x1c0] sm:$0xff] }
  0x7e   :  { %494 = vmatpush1.bf16.msra.mxu1 %v493_v44  ;;  %v531_v35 = vpack.c.bf16 %v342_v33, %v340_v32  ;;  %v341_v37 = vld [vmem:[#allocation10 + $0x1d0] sm:$0xff]  ;;  %v344_v39 = vld [vmem:[#allocation10 + $0x1e8] sm:$0xff]  ;;  %v346_v40 = vld [vmem:[#allocation10 + $0x1f8] sm:$0xff] }
  0x7f   :  { %496 = vmatprep.subr.bf16.mxu1 %v495_v45  ;;  %v533_v38 = vpack.c.bf16 %v341_v37, %v339_v36  ;;  %v535_v41 = vpack.c.bf16 %v346_v40, %v344_v39  ;;  %v343_v42 = vld [vmem:[#allocation10 + $0x1e0] sm:$0xff]  ;;  %v345_v43 = vld [vmem:[#allocation10 + $0x1f0] sm:$0xff]  ;;  %v269_v45 = vlaneseq  ;;  %v267_v48 = vld [vmem:[%s825_s4] sm:$0x3]  ;;  %s448_s4 = sld [smem:[#allocation11]] }
  0x80   :  { %v537_v44 = vpack.c.bf16 %v345_v43, %v343_v42  ;;  %v347_v58 = vld [vmem:[%s827_s6] sm:$0x3]  ;;  %s470_s6 = sld [smem:[#allocation11 + $0x1]] }
  0x81   :  { %v270_v46 = vshrl.u32 %v269_v45, 7  ;;  %v432_v61 = vld [vmem:[%s828_s7] sm:$0x3] }
  0x82   :  { %498 = vmatpush1.bf16.msra.mxu1 %v497_v50 }
  0x83   :  { %500 = vmatprep.subr.bf16.mxu1 %v499_v51  ;;  %v271_v47 = vsub.s32 0, %v270_v46  ;;  %v275_v49 = vsub.s32 1, %v270_v46 }
  0x85   :  { %v272_v50 = vrot.slane %v267_v48, %v271_v47  ;;  %v276_v51 = vrot.slane %v267_v48, %v275_v49  ;;  %v352_v59 = vrot.slane %v347_v58, %v271_v47  ;;  %v356_v60 = vrot.slane %v347_v58, %v275_v49 }
  0x86   :  { %502 = vmatpush1.bf16.msra.mxu1 %v501_v56  ;;  %v437_v1 = vrot.slane %v432_v61, %v271_v47  ;;  %v441_v6 = vrot.slane %v432_v61, %v275_v49  ;;  %v449_v9 = vstv %s448_s4 }
  0x87   :  { %504 = vmatprep.subr.bf16.mxu1 %v503_v57 }
  0x8a   :  { %506 = vmatpush1.bf16.msra.mxu1 %v505_v62 }
  0x8b   :  { %508 = vmatprep.subr.bf16.mxu1 %v507_v63 }
  0x8e   :  { %510 = vmatpush1.bf16.msra.mxu1 %v509_v4 }
  0x8f   :  { %512 = vmatprep.subr.bf16.mxu1 %v511_v5 }
  0x92   :  { %514 = vmatpush1.bf16.msra.mxu1 %v513_v10  ;;  %v454_v10 = vstv %s470_s6 }
  0x93   :  { %516 = vmatprep.subr.bf16.mxu1 %v515_v11 }
  0x96   :  { %518 = vmatpush1.bf16.msra.mxu1 %v517_v16 }
  0x97   :  { %520 = vmatprep.subr.bf16.mxu1 %v519_v17 }
  0x9a   :  { %522 = vmatpush1.bf16.msra.mxu1 %v521_v22 }
  0x9b   :  { %524 = vmatprep.subr.bf16.mxu1 %v523_v23 }
  0x9e   :  { %526 = vmatpush1.bf16.msra.mxu1 %v525_v28 }
  0x9f   :  { %528 = vmatprep.subr.bf16.mxu1 %v527_v29 }
  0xa2   :  { %530 = vmatpush1.bf16.msra.mxu1 %v529_v34 }
  0xa3   :  { %532 = vmatprep.subr.bf16.mxu1 %v531_v35 }
  0xa6   :  { %534 = vmatpush1.bf16.msra.mxu1 %v533_v38 }
  0xa7   :  { %536 = vmatprep.subr.bf16.mxu1 %v535_v41 }
  0xaa   :  { %538 = vmatpush1.bf16.msra.mxu1 %v537_v44 }
 0x145   :  { %v262_v52 = vpop.f32.mrb[0].mxu0 }
 0x146   :  { %v279_v53 = vadd.f32 %v272_v50, %v262_v52  ;;  %v264_v54 = vpop.f32.mrb[1].mxu0 }
 0x147   :  { %v280_v55 = vadd.f32 %v276_v51, %v264_v54 }
 0x148   :  { %v281_v57 = vmax.f32 %v279_v53, 0.0 }
 0x149   :  { %v282_v56 = vmax.f32 %v280_v55, 0.0 }
 0x14b   :  { %423 = vmatprep.mubr.f32.mxu1 %v282_v56 }
 0x14c   :  { %424 = vmatmul.mubr.f32.vlgmr.msra.gmra.mrb[0].mxu1 %v281_v57 }
 0x21f   :  { %v425_v62 = vpop.f32.mrb[0].mxu1 }
 0x220   :  { %v426_v63 = vadd.f32 %v425_v62, %v352_v59  ;;  %v427_v0 = vpop.f32.mrb[1].mxu1 }
 0x221   :  { %v428_v2 = vadd.f32 %v427_v0, %v356_v60 }
 0x222   :  { %v430_v3 = vmax.f32 %v426_v63, 0.0 }
 0x223   :  { %v431_v4 = vmax.f32 %v428_v2, 0.0 }
 0x224   :  { %v444_v5 = vmul.f32 %v437_v1, %v430_v3 }
 0x225   :  { %v445_v7 = vmul.f32 %v441_v6, %v431_v4 }
 0x226   :  { %446 = vadd.xlane.f32.xlu0 %v444_v5 }
 0x22a   :  { %451 = vadd.xlane.f32.xlu0 %v445_v7 }
 0x2b3   :  { %v447_v8 = vpop.xlane.xlu0 %446 }
 0x2b4   :  { %v450_v12 = vadd.f32 %v449_v9, %v447_v8 }
 0x2b7   :  { %v452_v11 = vpop.xlane.xlu0 %451 }
 0x2b8   :  { %v455_v13 = vadd.f32 %v454_v10, %v452_v11 }
 0x2ba   :  { %v457_v14 = vsel %vm456_vm2, %v450_v12, %v455_v13 }
 0x2bb   :  { %459 = vst.msk [vmem:[%s830_s9] sm:$0xff] %vm458_vm3, %v457_v14 }
 0x2bc   :  { %464 = vsyncpa [#allocation3], 1 }
 0x2bd   :  { %465 = vsyncpa [#allocation6], 1 }
 0x2be   :  { %466 = vsyncpa [#allocation9], 1 }
 0x2bf   :  { %467 = vsyncpa [#allocation4], 1 }

</bundles_post_ra>
